<compile_context>
chip_gen: v7x
topology: tpu7x:2x2x1
jax: 0.10.0
libtpu: 0.0.40
codegen_flags: <defaults>
</compile_context>

<pallas_src>
import math
from functools import partial

import jax
import jax.numpy as jnp
import numpy as np
from jax.experimental import pallas as pl
from jax.experimental.pallas import tpu as pltpu


# ------------------------- helpers -------------------------
def _gelu_f32(x):
    # exact-GELU via Abramowitz & Stegun erf approximation (max abs err ~1.5e-7)
    z = x * 0.7071067811865476
    a = jnp.abs(z)
    t = 1.0 / (1.0 + 0.3275911 * a)
    poly = t * (0.254829592 + t * (-0.284496736 + t * (1.421413741
                + t * (-1.453152027 + t * 1.061405429))))
    erf_abs = 1.0 - poly * jnp.exp(-a * a)
    erf = jnp.where(z >= 0.0, erf_abs, -erf_abs)
    return 0.5 * x * (1.0 + erf)


def _time_chunk(S, max_chunk=16):
    tc = min(S, max_chunk)
    while S % tc != 0:
        tc -= 1
    return tc


# ------------------------- layer-0 projection: LayerNorm + x @ W_ih (all gates) ----------
def _ln_proj_kernel(x_ref, lnw_ref, lnb_ref, w_ref, b_ref, o_ref):
    # x: (N, F); lnw/lnb: (1, F); w: (1, F, 3H); b: (1, 1, 3H); o: (1, N, 3H)
    x = x_ref[...].astype(jnp.float32)
    mean = jnp.mean(x, axis=-1, keepdims=True)
    xc = x - mean
    var = jnp.mean(xc * xc, axis=-1, keepdims=True)
    xn = xc * jax.lax.rsqrt(var + 1e-5) * lnw_ref[...] + lnb_ref[...]
    gi = jnp.dot(xn, w_ref[0], preferred_element_type=jnp.float32) + b_ref[0]
    o_ref[0] = gi.astype(o_ref.dtype)


def ln_input_projection(x2d, ln_w, ln_b, wih, bgi):
    # x2d: (N, F) time-major-flattened; wih: (D, F, 3H); bgi: (D, 1, 3H) -> (D, N, 3H)
    D, F, G = wih.shape
    N = x2d.shape[0]
    return pl.pallas_call(
        _ln_proj_kernel,
        grid=(D,),
        in_specs=[
            pl.BlockSpec((N, F), lambda d: (0, 0)),
            pl.BlockSpec((1, F), lambda d: (0, 0)),
            pl.BlockSpec((1, F), lambda d: (0, 0)),
            pl.BlockSpec((1, F, G), lambda d: (d, 0, 0)),
            pl.BlockSpec((1, 1, G), lambda d: (d, 0, 0)),
        ],
        out_specs=pl.BlockSpec((1, N, G), lambda d: (d, 0, 0)),
        out_shape=jax.ShapeDtypeStruct((D, N, G), jnp.float32),
        compiler_params=pltpu.CompilerParams(dimension_semantics=("parallel",)),
    )(x2d, ln_w, ln_b, wih, bgi)


# ------------------------- layer>0 projection: y(D_in,S,B,H) @ W_ih (all gates) ----------
def _proj_kernel(y_ref, w_ref, b_ref, o_ref, *, d_in):
    # y: (D_in, N, H); w: (1, D_in, H, 3H); b: (1, 1, 3H); o: (1, N, 3H)
    gi = b_ref[0].astype(jnp.float32)
    for j in range(d_in):   # static loop; avoids a concat of the two directions
        gi = gi + jnp.dot(y_ref[j].astype(jnp.float32), w_ref[0, j],
                          preferred_element_type=jnp.float32)
    o_ref[0] = gi.astype(o_ref.dtype)


def hidden_input_projection(y, wih, bgi):
    # y: (D_in, N, H); wih: (D_out, D_in, H, 3H); bgi: (D_out, 1, 3H) -> (D_out, N, 3H)
    D_in, N, H = y.shape
    D_out, _, _, G = wih.shape
    return pl.pallas_call(
        partial(_proj_kernel, d_in=D_in),
        grid=(D_out,),
        in_specs=[
            pl.BlockSpec((D_in, N, H), lambda d: (0, 0, 0)),
            pl.BlockSpec((1, D_in, H, G), lambda d: (d, 0, 0, 0)),
            pl.BlockSpec((1, 1, G), lambda d: (d, 0, 0)),
        ],
        out_specs=pl.BlockSpec((1, N, G), lambda d: (d, 0, 0)),
        out_shape=jax.ShapeDtypeStruct((D_out, N, G), jnp.float32),
        compiler_params=pltpu.CompilerParams(dimension_semantics=("parallel",)),
    )(y, wih, bgi)


# ------------------------- recurrent kernel: both directions, chunked timesteps ----------
def _gru_rec_kernel(gi_ref, h0_ref, whh_ref, bhn_ref, out_ref, hn_ref, h_scr,
                    *, H, TC, apply_gelu):
    d = pl.program_id(0)
    tc = pl.program_id(1)

    @pl.when(tc == 0)
    def _():
        h_scr[...] = h0_ref[0].astype(jnp.float32)

    whh = whh_ref[0].astype(jnp.float32)     # (H, 3H)  fused [r|z|n]
    bhn = bhn_ref[0].astype(jnp.float32)     # (1, H)

    def step(i, h):
        # local time index: forward for d==0, reversed for d==1
        lt = i + d * (TC - 1 - 2 * i)
        gi = gi_ref[0, lt].astype(jnp.float32)                       # (B, 3H)
        gh = jnp.dot(h, whh, preferred_element_type=jnp.float32)     # (B, 3H)
        r = jax.nn.sigmoid(gi[:, 0:H] + gh[:, 0:H])
        z = jax.nn.sigmoid(gi[:, H:2 * H] + gh[:, H:2 * H])
        n = jnp.tanh(gi[:, 2 * H:3 * H] + r * (gh[:, 2 * H:3 * H] + bhn))
        h_new = (1.0 - z) * n + z * h
        o = _gelu_f32(h_new) if apply_gelu else h_new
        out_ref[0, lt] = o.astype(out_ref.dtype)
        return h_new

    h_final = jax.lax.fori_loop(0, TC, step, h_scr[...], unroll=True)
    h_scr[...] = h_final

    @pl.when(tc == pl.num_programs(1) - 1)
    def _():
        hn_ref[0] = h_final.astype(hn_ref.dtype)


def gru_layer(gi, h0, whh, bhn, *, apply_gelu):
    # gi: (D, S, B, 3H); h0: (D, B, H); whh: (D, H, 3H); bhn: (D, 1, H)
    D, S, B, G = gi.shape
    H = whh.shape[1]
    TC = _time_chunk(S)
    nch = S // TC

    def t_map(d, tc):
        tb = tc + d * (nch - 1 - 2 * tc)     # forward for d==0, reversed for d==1
        return (d, tb, 0, 0)

    out, hn = pl.pallas_call(
        partial(_gru_rec_kernel, H=H, TC=TC, apply_gelu=apply_gelu),
        grid=(D, nch),
        in_specs=[
            pl.BlockSpec((1, TC, B, G), t_map),
            pl.BlockSpec((1, B, H), lambda d, tc: (d, 0, 0)),
            pl.BlockSpec((1, H, G), lambda d, tc: (d, 0, 0)),
            pl.BlockSpec((1, 1, H), lambda d, tc: (d, 0, 0)),
        ],
        out_specs=[
            pl.BlockSpec((1, TC, B, H), t_map),
            pl.BlockSpec((1, B, H), lambda d, tc: (d, 0, 0)),
        ],
        out_shape=[
            jax.ShapeDtypeStruct((D, S, B, H), jnp.float32),
            jax.ShapeDtypeStruct((D, B, H), jnp.float32),
        ],
        scratch_shapes=[pltpu.VMEM((B, H), jnp.float32)],
        compiler_params=pltpu.CompilerParams(
            dimension_semantics=("parallel", "arbitrary")),
    )(gi, h0, whh, bhn)
    return out, hn


# ------------------------- Parameter init (deterministic, in-script) -------------------------
def init_params(key, input_size, hidden_size, num_layers, bidirectional=True):
    D = 2 if bidirectional else 1
    H = hidden_size
    params = {
        "ln_w": jnp.ones((1, input_size), jnp.float32),   # nn.LayerNorm defaults
        "ln_b": jnp.zeros((1, input_size), jnp.float32),
        "layers": [],
    }
    for layer in range(num_layers):
        in_feat = input_size if layer == 0 else H * D
        wih_l, whh_l, bgi_l, bhn_l = [], [], [], []
        for _d in range(D):
            key, k1, k2, k3, k4 = jax.random.split(key, 5)
            a_ih = math.sqrt(6.0 / (3 * H + in_feat))     # xavier_uniform on (3H, in)
            a_hh = math.sqrt(6.0 / (3 * H + H))           # xavier_uniform on (3H, H)
            a_b = 1.0 / math.sqrt(H)                      # PyTorch GRU bias default
            w_ih = jax.random.uniform(k1, (3 * H, in_feat), jnp.float32, -a_ih, a_ih)
            w_hh = jax.random.uniform(k2, (3 * H, H), jnp.float32, -a_hh, a_hh)
            b_ih = jax.random.uniform(k3, (3 * H,), jnp.float32, -a_b, a_b)
            b_hh = jax.random.uniform(k4, (3 * H,), jnp.float32, -a_b, a_b)
            wih_l.append(w_ih.T)                          # (in_feat, 3H), cols [r|z|n]
            whh_l.append(w_hh.T)                          # (H, 3H)
            # pre-sum r/z biases into the (hoisted) input projection bias
            b_gi = jnp.concatenate([b_ih[0:H] + b_hh[0:H],
                                    b_ih[H:2 * H] + b_hh[H:2 * H],
                                    b_ih[2 * H:3 * H]])
            bgi_l.append(b_gi[None, :])                   # (1, 3H)
            bhn_l.append(b_hh[2 * H:3 * H][None, :])      # (1, H)  (n-gate hidden bias)
        lp = {"whh": jnp.stack(whh_l, 0),                 # (D, H, 3H)
              "bgi": jnp.stack(bgi_l, 0),                 # (D, 1, 3H)
              "bhn": jnp.stack(bhn_l, 0)}                 # (D, 1, H)
        if layer == 0:
            lp["wih"] = jnp.stack(wih_l, 0)               # (D, F, 3H)
        else:                                             # split 2H input rows by src dir
            lp["wih"] = jnp.stack([w.reshape(D, H, 3 * H) for w in wih_l], 0)
        params["layers"].append(lp)
    return params


# ------------------------- Forward: LayerNorm -> GRU -> GELU -------------------------
def gru_cell_forward(params, x, state=None):
    # x: (B, S, F) batch_first; returns (gelu(output) (B,S,D*H), hn (L*D,B,H))
    B, S, F0 = x.shape
    layers = params["layers"]
    L = len(layers)
    D, H = layers[0]["whh"].shape[0], layers[0]["whh"].shape[1]

    if state is None:
        state = jnp.zeros((L * D, B, H), jnp.float32)

    # time-major flatten (only small transpose in the whole pipeline)
    x2d = jnp.transpose(x, (1, 0, 2)).reshape(S * B, F0)

    hns = []
    y = None
    for li, lp in enumerate(layers):
        if li == 0:
            gi = ln_input_projection(x2d, params["ln_w"], params["ln_b"],
                                     lp["wih"], lp["bgi"])            # (D, S*B, 3H)
        else:
            gi = hidden_input_projection(y.reshape(D, S * B, H),
                                         lp["wih"], lp["bgi"])        # (D, S*B, 3H)
        gi = gi.reshape(D, S, B, 3 * H)
        h0 = state[li * D:(li + 1) * D]
        y, hn = gru_layer(gi, h0, lp["whh"], lp["bhn"], apply_gelu=(li == L - 1))
        hns.append(hn)

    output = jnp.transpose(y, (2, 1, 0, 3)).reshape(B, S, D * H)      # (B, S, D*H)
    hn_all = jnp.concatenate(hns, axis=0)                             # (L*D, B, H)
    return output, hn_all


# ------------------------- pure-JAX reference (for a loose sanity check) -----------------
def _reference(params, x, state):
    B, S, F0 = x.shape
    layers = params["layers"]
    L = len(layers)
    D, H = layers[0]["whh"].shape[0], layers[0]["whh"].shape[1]
    mean = jnp.mean(x, -1, keepdims=True)
    var = jnp.mean((x - mean) ** 2, -1, keepdims=True)
    xn = (x - mean) / jnp.sqrt(var + 1e-5) * params["ln_w"][0] + params["ln_b"][0]
    inp = jnp.transpose(xn, (1, 0, 2))
    hns = []
    for li, lp in enumerate(layers):
        outs = []
        for d in range(D):
            wih = lp["wih"][d] if li == 0 else lp["wih"][d].reshape(D * H, 3 * H)
            whh, bgi, bhn = lp["whh"][d], lp["bgi"][d], lp["bhn"][d]
            h = state[li * D + d]
            seq = inp if d == 0 else inp[::-1]

            def step(h, x_t, wih=wih, whh=whh, bgi=bgi, bhn=bhn):
                gi = x_t @ wih + bgi
                gh = h @ whh
                r = jax.nn.sigmoid(gi[:, :H] + gh[:, :H])
                z = jax.nn.sigmoid(gi[:, H:2 * H] + gh[:, H:2 * H])
                n = jnp.tanh(gi[:, 2 * H:] + r * (gh[:, 2 * H:] + bhn))
                h = (1 - z) * n + z * h
                return h, h

            hT, ys = jax.lax.scan(step, h, seq)
            outs.append(ys if d == 0 else ys[::-1])
            hns.append(hT)
        inp = jnp.concatenate(outs, -1)
    out = jax.nn.gelu(jnp.transpose(inp, (1, 0, 2)), approximate=False)
    return out, jnp.stack(hns, 0)


if __name__ == "__main__":
    B, S = 2, 8
    input_size, hidden_size, num_layers = 16, 32, 2

    key = jax.random.PRNGKey(0)
    k_x, k_p = jax.random.split(key)
    x = jax.random.normal(k_x, (B, S, input_size), jnp.float32)
    params = init_params(k_p, input_size, hidden_size, num_layers, bidirectional=True)

    output, hn = gru_cell_forward(params, x, state=None)
    jax.block_until_ready(output)
    jax.block_until_ready(hn)

    assert output.shape == (B, S, 2 * hidden_size)
    assert hn.shape == (num_layers * 2, B, hidden_size)

    ref_out, ref_hn = _reference(params, x, jnp.zeros_like(hn))
    assert np.allclose(np.asarray(output), np.asarray(ref_out), atol=2e-3, rtol=2e-3)
    assert np.allclose(np.asarray(hn), np.asarray(ref_hn), atol=2e-3, rtol=2e-3)

    print("KERNEL_OK")
</pallas_src>

<mosaic_0001>
module attributes {stable_mosaic.version = 11 : i64} {
  func.func @_ln_proj_kernel(%arg0: i32, %arg1: memref<16x16xf32, #tpu.memory_space<vmem>>, %arg2: memref<1x16xf32, #tpu.memory_space<vmem>>, %arg3: memref<1x16xf32, #tpu.memory_space<vmem>>, %arg4: memref<1x16x96xf32, #tpu.memory_space<vmem>>, %arg5: memref<1x1x96xf32, #tpu.memory_space<vmem>>, %arg6: memref<1x16x96xf32, #tpu.memory_space<vmem>>) attributes {dimension_semantics = [#tpu.dimension_semantics<parallel>], iteration_bounds = array<i64: 2>, scalar_prefetch = 0 : i64, scratch_operands = 0 : i64, tpu.core_type = #tpu.core_type<tc>, window_params = [{pipeline_mode = #tpu.pipeline_mode<synchronous>, transform_indices = @transform_0, window_bounds = array<i64: 16, 16>}, {pipeline_mode = #tpu.pipeline_mode<synchronous>, transform_indices = @transform_1, window_bounds = array<i64: 1, 16>}, {pipeline_mode = #tpu.pipeline_mode<synchronous>, transform_indices = @transform_2, window_bounds = array<i64: 1, 16>}, {transform_indices = @transform_3, window_bounds = array<i64: 1, 16, 96>}, {transform_indices = @transform_4, window_bounds = array<i64: 1, 1, 96>}, {transform_indices = @transform_5, window_bounds = array<i64: 1, 16, 96>}]} {
    %c0 = arith.constant 0 : index
    %c0_0 = arith.constant 0 : index
    %0 = vector.load %arg1[%c0, %c0_0] : memref<16x16xf32, #tpu.memory_space<vmem>>, vector<16x16xf32>
    %cst = arith.constant dense<0.000000e+00> : vector<16xf32>
    %1 = vector.multi_reduction <add>, %0, %cst [1] : vector<16x16xf32> to vector<16xf32>
    %2 = vector.shape_cast %1 : vector<16xf32> to vector<16x1xf32>
    %cst_1 = arith.constant 1.600000e+01 : f32
    %3 = vector.broadcast %cst_1 : f32 to vector<16x1xf32>
    %4 = arith.divf %2, %3 : vector<16x1xf32>
    %5 = vector.broadcast %4 : vector<16x1xf32> to vector<16x16xf32>
    %6 = arith.subf %0, %5 : vector<16x16xf32>
    %7 = arith.mulf %6, %6 : vector<16x16xf32>
    %cst_2 = arith.constant dense<0.000000e+00> : vector<16xf32>
    %8 = vector.multi_reduction <add>, %7, %cst_2 [1] : vector<16x16xf32> to vector<16xf32>
    %9 = vector.shape_cast %8 : vector<16xf32> to vector<16x1xf32>
    %cst_3 = arith.constant 1.600000e+01 : f32
    %10 = vector.broadcast %cst_3 : f32 to vector<16x1xf32>
    %11 = arith.divf %9, %10 : vector<16x1xf32>
    %cst_4 = arith.constant 9.99999974E-6 : f32
    %12 = vector.broadcast %cst_4 : f32 to vector<16x1xf32>
    %13 = arith.addf %11, %12 : vector<16x1xf32>
    %14 = math.rsqrt %13 : vector<16x1xf32>
    %15 = vector.broadcast %14 : vector<16x1xf32> to vector<16x16xf32>
    %16 = arith.mulf %6, %15 : vector<16x16xf32>
    %c0_5 = arith.constant 0 : index
    %c0_6 = arith.constant 0 : index
    %17 = vector.load %arg2[%c0_5, %c0_6] : memref<1x16xf32, #tpu.memory_space<vmem>>, vector<1x16xf32>
    %18 = vector.broadcast %17 : vector<1x16xf32> to vector<16x16xf32>
    %19 = arith.mulf %16, %18 : vector<16x16xf32>
    %c0_7 = arith.constant 0 : index
    %c0_8 = arith.constant 0 : index
    %20 = vector.load %arg3[%c0_7, %c0_8] : memref<1x16xf32, #tpu.memory_space<vmem>>, vector<1x16xf32>
    %21 = vector.broadcast %20 : vector<1x16xf32> to vector<16x16xf32>
    %22 = arith.addf %19, %21 : vector<16x16xf32>
    %c0_9 = arith.constant 0 : index
    %c0_10 = arith.constant 0 : index
    %c0_11 = arith.constant 0 : index
    %23 = vector.load %arg4[%c0_9, %c0_10, %c0_11] : memref<1x16x96xf32, #tpu.memory_space<vmem>>, vector<1x16x96xf32>
    %24 = vector.shape_cast %23 : vector<1x16x96xf32> to vector<16x96xf32>
    %cst_12 = arith.constant dense<0.000000e+00> : vector<16x96xf32>
    %25 = tpu.matmul %22, %24, %cst_12 {dimension_numbers = #tpu.dot_dimension_numbers<[1], [0], [0], [1], [0, 0, 1, 1], [], []>} : vector<16x16xf32>, vector<16x96xf32>, vector<16x96xf32> -> vector<16x96xf32>
    %c0_13 = arith.constant 0 : index
    %c0_14 = arith.constant 0 : index
    %c0_15 = arith.constant 0 : index
    %26 = vector.load %arg5[%c0_13, %c0_14, %c0_15] : memref<1x1x96xf32, #tpu.memory_space<vmem>>, vector<1x1x96xf32>
    %27 = vector.shape_cast %26 : vector<1x1x96xf32> to vector<1x96xf32>
    %28 = vector.broadcast %27 : vector<1x96xf32> to vector<16x96xf32>
    %29 = arith.addf %25, %28 : vector<16x96xf32>
    %c0_16 = arith.constant 0 : index
    %c0_17 = arith.constant 0 : index
    %c0_18 = arith.constant 0 : index
    %30 = vector.load %arg6[%c0_16, %c0_17, %c0_18] : memref<1x16x96xf32, #tpu.memory_space<vmem>>, vector<1x16x96xf32>
    %31 = vector.shape_cast %30 : vector<1x16x96xf32> to vector<16x96xf32>
    %32 = vector.shape_cast %29 : vector<16x96xf32> to vector<1x16x96xf32>
    tpu.vector_store %arg6[%c0_16, %c0_17, %c0_18], %32 {strides = array<i32>} : memref<1x16x96xf32, #tpu.memory_space<vmem>>, vector<1x16x96xf32>,
    return
  }
  func.func @transform_0(%arg0: i32) -> (i32, i32) {
    %c0_i32 = arith.constant 0 : i32
    %c0_i32_0 = arith.constant 0 : i32
    %c0_i32_1 = arith.constant 0 : i32
    return %c0_i32, %c0_i32_0 : i32, i32
  }
  func.func @transform_1(%arg0: i32) -> (i32, i32) {
    %c0_i32 = arith.constant 0 : i32
    %c0_i32_0 = arith.constant 0 : i32
    %c0_i32_1 = arith.constant 0 : i32
    return %c0_i32, %c0_i32_0 : i32, i32
  }
  func.func @transform_2(%arg0: i32) -> (i32, i32) {
    %c0_i32 = arith.constant 0 : i32
    %c0_i32_0 = arith.constant 0 : i32
    %c0_i32_1 = arith.constant 0 : i32
    return %c0_i32, %c0_i32_0 : i32, i32
  }
  func.func @transform_3(%arg0: i32) -> (i32, i32, i32) {
    %c0_i32 = arith.constant 0 : i32
    %c0_i32_0 = arith.constant 0 : i32
    %c0_i32_1 = arith.constant 0 : i32
    return %arg0, %c0_i32, %c0_i32_0 : i32, i32, i32
  }
  func.func @transform_4(%arg0: i32) -> (i32, i32, i32) {
    %c0_i32 = arith.constant 0 : i32
    %c0_i32_0 = arith.constant 0 : i32
    %c0_i32_1 = arith.constant 0 : i32
    return %arg0, %c0_i32, %c0_i32_0 : i32, i32, i32
  }
  func.func @transform_5(%arg0: i32) -> (i32, i32, i32) {
    %c0_i32 = arith.constant 0 : i32
    %c0_i32_0 = arith.constant 0 : i32
    %c0_i32_1 = arith.constant 0 : i32
    return %arg0, %c0_i32, %c0_i32_0 : i32, i32, i32
  }
}

</mosaic_0001>

<bundles_post_ra>
// kernel: tpu_custom_call.1
= control target key start
LH: loop header
LB: loop body
LE: loop exit
PB: predicated region body
PF: predicated region fallthrough
CT: control target
= control target key end

     0   :  { %10 = vsyncpa [#allocation3], 0  ;;  %s1019_s0 = inlined_call_operand.hbm [shape: f32[16,16], index: 0, kind: input, shape index: {}]   ;;  %s1020_s1 = inlined_call_operand.vmem [shape: f32[1,16], index: 1, kind: input, shape index: {}]   ;;  %s1021_s2 = inlined_call_operand.vmem [shape: f32[1,16], index: 2, kind: input, shape index: {}]   ;;  %s1022_s3 = inlined_call_operand.hbm [shape: f32[2,16,96], index: 3, kind: input, shape index: {}]   ;;  %s1023_s4 = inlined_call_operand.vmem [shape: f32[2,1,96], index: 4, kind: input, shape index: {}]   ;;  %s1024_s5 = inlined_call_operand.hbm [shape: f32[2,16,96], index: 5, kind: output, shape index: {}]  }
   0x1   :  { %11 = vsyncpa [#allocation6], 0 }
   0x2   :  { %13 = vsyncpa [#allocation6 + $0x1], 0 }
   0x3   :  { %14 = vsyncpa [#allocation4], 0 }
   0x4   :  { %16 = vsyncpa [#allocation4 + $0x1], 0  ;;  %s791_s18 = smov 0   ;;  %s793_s19 = smov 0  }
   0x5   :  { %s795_s20 = smov 0   ;;  %s797_s21 = smov 0  }
   0x6 LB: > { %s812_s22 = sadd.s32 4294967295, %s752_s21   ;;  %s521_s23 = sadd.s32 4294967294, %s752_s21   ;;  %s752_s21 = sphi %s797_s21, %s1044_s21   ;;  %s748_s20 = sphi %s795_s20, %s1043_s20   ;;  %s744_s19 = sphi %s793_s19, %s1042_s19   ;;  %s740_s18 = sphi %s791_s18, %s1041_s18  }
   0x7   : > { %p105_p0 = scmp.ne.s32.totalorder %s744_s19, %s740_s18  ;;  %p1025_p1 = scmp.eq.s32.totalorder %s812_s22, 0 }
   0x8   : > { %p161_p3 = scmp.eq.s32.totalorder %s521_s23, 1  ;;  %p522_p5 = scmp.ge.s32.totalorder %s752_s21, 1 }
   0x9   : > { %p821_p4 = por %p1025_p1, %p105_p0  ;;  %p168_p7 = scmp.lt.s32.totalorder %s752_s21, 3 }
   0xa   : > { %p826_p6 = por %p161_p3, %p105_p0  ;;  %s754_s27 = smov [#allocation2]  }
   0xb   : > { %s1028_s24 = scalar_select %p821_p4, 1, 0 }
   0xc   : > { %s1029_s25 = scalar_select %p826_p6, 1, 0 }
   0xd   : > { %p831_p8 = pnand %p522_p5, %p168_p7  ;;  %s180_s28 = sshll.u32 %s754_s27, 4  ;;  %s835_s28 = int_to_ptr.vmem [resolvable:$true] %s180_s28 }
   0xe   : > { %s847_s30 = sadd.s32 1, %s752_s21   ;;  %s92_s6 = sadd.s32 1, %s748_s20 }
   0xf   : > { %s1030_s26 = scalar_select %p831_p8, 1, 0 }
  0x10   : > { %p567_p9 = pneg %p831_p8  ;;  %s89_s7 = ssub.s32 %s752_s21, %s847_s30 }
  0x11   : > { %s624_s10 = scalar_lea.hbm %s1019_s0, 256 }
  0x12   : > { %p842_p11 = pnand %p567_p9, %p1025_p1  ;;  %p625_p12 = scmp.ne.s32.totalorder %s1019_s0, %s624_s10 }
  0x13   : > { %p631_p5 = scmp.lt.u32.totalorder %s624_s10, %s1019_s0 }
  0x14   : > { %p626_p13 = pneg %p842_p11 }
  0x16   : > { %p627_p0 = pnand %p626_p13, %p625_p12 }
  0x18   : > { %p628_p3 = pneg %p627_p0 }
  0x1a   : > { %p633_p7 = pnand %p631_p5, %p628_p3 }
  0x1c   : > { %636 = shalt.err (!%p633_p7)
}
  0x1d   : > { %s637_s15 = scalar_lea.vmem %s835_s28, 256  ;;  %p645_p2 = scmp.lt.s32.totalorder %s835_s28, %s835_s28 }
  0x1e   : > { %p638_p9 = scmp.ne.s32.totalorder %s835_s28, %s637_s15  ;;  %p646_p6 = scmp.lt.s32.totalorder %s637_s15, %s637_s15 }
  0x20   : > { %p640_p10 = pnand %p638_p9, %p626_p13  ;;  %p647_p4 = por %p646_p6, %p645_p2 }
  0x22   : > { %p641_p1 = pneg %p640_p10 }
  0x24   : > { %p648_p8 = pnand %p647_p4, %p641_p1 }
  0x26   : > { %651 = shalt.err (!%p648_p8)
}
  0x27   : > { %s755_s16 = smov 128   ;;  %s756_s17 = smov 8  }
  0x28   : > { %570 = dma.hbm_to_vmem [thread:$0]  (!%p842_p11), %s1019_s0, 256, %s835_s28, [#allocation3], %s755_s16, %s755_s16, %s756_s17  }
  0x29   : > { %p90_p1 = scmp.eq.s32.totalorder %s89_s7, 0  ;;  %p99_p2 = scmp.ne.s32.totalorder %s748_s20, %s744_s19 }
  0x2a   : > { %p100_p4 = scmp.eq.s32.totalorder %s752_s21, 0  ;;  %p580_p6 = scmp.lt.s32.totalorder %s752_s21, 2 }
  0x2b   : > { %s881_s8 = scalar_select %p90_p1, %s748_s20, %s92_s6  }
  0x2c   : > { %p101_p8 = por %p100_p4, %p99_p2  ;;  %p1032_p10 = scmp.eq.s32.totalorder %s812_s22, 1 }
  0x2d   : > { %s200_s29 = sand.u32 1, %s748_s20   ;;  %s542_s10 = sshll.u32 %s752_s21, 8 }
  0x2e   : > { %p885_p12 = por %p1032_p10, %p99_p2  ;;  %s525_s11 = sshll.u32 %s200_s29, 4 }
  0x2f   : > { %s894_s14 = scalar_lea.hbm %s1022_s3, %s542_s10  ;;  %s204_s28 = scalar_lea.vmem [#allocation5], %s525_s11 }
  0x30   : > { %s211_s6 = sshll.u32 %s204_s28, 4  ;;  %p896_p11 = pnand %p580_p6, %p101_p8  ;;  %s900_s6 = int_to_ptr.vmem [resolvable:$true] %s211_s6 }
  0x31   : > { %s902_s15 = scalar_lea.sflag [#allocation6], %s200_s29  ;;  %s652_s23 = scalar_lea.hbm %s894_s14, 256 }
  0x32   : > { %p653_p13 = scmp.ne.s32.totalorder %s894_s14, %s652_s23  ;;  %p654_p0 = pneg %p896_p11 }
  0x33   : > { %s657_s11 = scalar_lea.hbm %s1022_s3, 512  ;;  %p658_p7 = scmp.lt.u32.totalorder %s894_s14, %s1022_s3 }
  0x34   : > { %p655_p3 = pnand %p654_p0, %p653_p13  ;;  %p659_p9 = scmp.lt.u32.totalorder %s657_s11, %s652_s23 }
  0x35   : > { %p661_p2 = scmp.lt.u32.totalorder %s652_s23, %s894_s14 }
  0x36   : > { %p656_p5 = pneg %p655_p3  ;;  %p660_p1 = por %p659_p9, %p658_p7 }
  0x38   : > { %p662_p4 = por %p661_p2, %p660_p1 }
  0x3a   : > { %p663_p6 = pnand %p662_p4, %p656_p5 }
  0x3c   : > { %666 = shalt.err (!%p663_p6)
}
  0x3d   : > { %s667_s29 = scalar_lea.vmem %s900_s6, 256  ;;  %s757_s28 = smov [#allocation5]  }
  0x3e   : > { %p668_p8 = scmp.ne.s32.totalorder %s900_s6, %s667_s29  ;;  %s672_s27 = sshll.u32 %s757_s28, 4  ;;  %s673_s27 = int_to_ptr.vmem [resolvable:$false] %s672_s27 }
  0x3f   : > { %s674_s10 = scalar_lea.vmem %s673_s27, 512  ;;  %p675_p3 = scmp.lt.s32.totalorder %s900_s6, %s673_s27 }
  0x40   : > { %p670_p10 = pnand %p668_p8, %p654_p0  ;;  %p676_p7 = scmp.lt.s32.totalorder %s674_s10, %s667_s29 }
  0x42   : > { %p671_p13 = pneg %p670_p10  ;;  %p677_p9 = por %p676_p7, %p675_p3 }
  0x44   : > { %p678_p1 = pnand %p677_p9, %p671_p13 }
  0x46   : > { %681 = shalt.err (!%p678_p1)
}
  0x47   : > { %574 = dma.hbm_to_vmem [thread:$0]  (!%p896_p11), %s894_s14, 256, %s900_s6, %s902_s15, %s755_s16, %s755_s16, %s756_s17  }
  0x48   : > { %p1035_p0 = scmp.ne.s32.totalorder %s1030_s26, 0 }
  0x49   : > { %p1036_p5 = scmp.eq.s32.totalorder (!%p1035_p0), %s812_s22, 0 }
  0x4a   : > { %229 = sbr.rel (%p1035_p0) target bundleno = 634 (0x27a), region = 40 }
  0x51   : > { %727 = dma.done.wait (%p1036_p5), [#allocation3], 256   ;;  %p1037_p2 = pmov %p1036_p5 }
  0x52   : > { %s940_s23 = sand.u32 1, %s744_s19   ;;  %p1038_p11 = scmp.ne.s32.totalorder %s1028_s24, 0 }
  0x53   : > { %729 = vsyncadd (%p1037_p2), [#allocation3], 4294967040  ;;  %s530_s7 = sshll.u32 %s940_s23, 4  ;;  %s236_s11 = scalar_lea.sflag [#allocation6], %s940_s23 }
  0x54   : > { %s239_s16 = scalar_lea.vmem [#allocation5], %s530_s7 }
  0x55   : > { %731 = dma.done.wait (%p1038_p11), %s236_s11, 256  }
  0x56   : > { %733 = vsyncadd (%p1038_p11), %s236_s11, 4294967040  ;;  %vm274_vm0 = vcmask 130048   ;;  %v272_v0 = vld [vmem:[#allocation2] sm:$0xff]  ;;  %v273_v1 = vld [vmem:[#allocation2 + $0x8] sm:$0xff]  ;;  %p269_p4 = scmp.lt.s32.totalorder %s812_s22, 1  ;;  %s268_s29 = scalar_lea.vmem [#allocation7], %s530_s7 }
  0x57   : > { %v275_v2 = vsel %vm274_vm0, %v272_v0, 0.0  ;;  %v278_v3 = vsel %vm274_vm0, %v273_v1, 0.0  ;;  %v320_v14 = vld [vmem:[%s239_s16] sm:$0xff]  ;;  %v321_v15 = vld [vmem:[%s239_s16 + $0x8] sm:$0xff]  ;;  %s427_s28 = sshll.u32 %s268_s29, 4  ;;  %s543_s27 = sshll.u32 %s812_s22, 8  ;;  %s970_s28 = int_to_ptr.vmem [resolvable:$true] %s427_s28 }
  0x58   : > { %276 = vadd.xlane.f32.xlu0 %v275_v2  ;;  %v555_v16 = vpack.c.bf16 %v321_v15, %v320_v14  ;;  %v532_v24 = vld [vmem:[%s1020_s1] ss:$0 sm:$0xff]  ;;  %s270_s6 = scalar_select %p269_p4, %s812_s22, 1  ;;  %vm410_vm1 = vcmask 785408  }
  0x59   : > { %v533_v26 = vld [vmem:[%s1021_s2] ss:$0 sm:$0xff]  ;;  %s975_s16 = scalar_lea.hbm %s1024_s5, %s543_s27  ;;  %s414_s7 = scalar_lea.sflag [#allocation4], %s940_s23 }
  0x5a   : > { %556 = vmatprep.subr.bf16.mxu0 %v555_v16  ;;  %s271_s13 = scalar_lea.vmem %s1023_s4, %s270_s6  ;;  %s682_s24 = scalar_lea.vmem %s970_s28, 256 }
  0x5b   : > { %558 = vmatpush3.bf16.msra.mxu0 %v555_v16  ;;  %v534_v33 = vld [vmem:[%s271_s13] ss:$0 sm:$0xff]  ;;  %p683_p6 = scmp.ne.s32.totalorder %s970_s28, %s682_s24  ;;  %s758_s22 = smov [#allocation7]  }
  0x5c   : > { %279 = vadd.xlane.f32.xlu0 %v278_v3  ;;  %s686_s26 = sshll.u32 %s758_s22, 4  ;;  %s687_s26 = int_to_ptr.vmem [resolvable:$false] %s686_s26 }
  0x5d   : > { %p684_p8 = pnand %p683_p6, %p885_p12  ;;  %s688_s17 = scalar_lea.vmem %s687_s26, 512 }
  0x5e   : > { %p689_p13 = scmp.lt.s32.totalorder %s970_s28, %s687_s26  ;;  %p690_p3 = scmp.lt.s32.totalorder %s688_s17, %s682_s24 }
  0x5f   : > { %p685_p10 = pneg %p684_p8 }
  0x60   : > { %p691_p7 = por %p690_p3, %p689_p13 }
  0x62   : > { %p692_p9 = pnand %p691_p7, %p685_p10 }
  0xe5   : > { %v277_v4 = vpop.xlane.xlu0 %276 }
  0xe6   : > { %v282_v5 = vmul.f32 0.0625, %v277_v4 }
  0xe8   : > { %v284_v6 = vsub.f32 %v272_v0, %v282_v5 }
  0xe9   : > { %v280_v7 = vpop.xlane.xlu0 %279 }
  0xea   : > { %v283_v8 = vmul.f32 0.0625, %v280_v7  ;;  %v286_v9 = vmul.f32 %v284_v6, %v284_v6 }
  0xec   : > { %v285_v10 = vsub.f32 %v273_v1, %v283_v8  ;;  %v288_v11 = vsel %vm274_vm0, %v286_v9, 0.0 }
  0xed   : > { %289 = vadd.xlane.f32.xlu1 %v288_v11 }
  0xee   : > { %v287_v12 = vmul.f32 %v285_v10, %v285_v10 }
  0xf0   : > { %v291_v13 = vsel %vm274_vm0, %v287_v12, 0.0 }
  0xf1   : > { %292 = vadd.xlane.f32.xlu1 %v291_v13 }
 0x17a   : > { %v290_v17 = vpop.xlane.xlu1 %289 }
 0x17b   : > { %v294_v18 = vmul.f32 0.0625, %v290_v17 }
 0x17d   : > { %v296_v19 = vadd.f32 1e-05, %v294_v18 }
 0x17e   : > { %v293_v20 = vpop.xlane.xlu1 %292 }
 0x17f   : > { %620 = vrsqrt.f32 %v296_v19  ;;  %v295_v21 = vmul.f32 0.0625, %v293_v20 }
 0x181   : > { %v297_v22 = vadd.f32 1e-05, %v295_v21 }
 0x183   : > { %622 = vrsqrt.f32 %v297_v22 }
 0x189   : > { %v621_v23 = vpop.eup %620 }
 0x18a   : > { %v300_v25 = vmul.f32 %v621_v23, %v284_v6 }
 0x18c   : > { %v309_v27 = vmul.f32 %v532_v24, %v300_v25 }
 0x18d   : > { %v623_v28 = vpop.eup %622 }
 0x18e   : > { %v301_v29 = vmul.f32 %v623_v28, %v285_v10  ;;  %v318_v30 = vadd.f32 %v533_v26, %v309_v27 }
 0x190   : > { %v310_v31 = vmul.f32 %v532_v24, %v301_v29  ;;  %552 = vmatprep.mubr.msk.f32.mxu0 %vm274_vm0, %v318_v30 }
 0x192   : > { %v319_v32 = vadd.f32 %v533_v26, %v310_v31 }
 0x194   : > { %553 = vmatmul.mubr.msk.f32.vlgmr.msra.gmra.mrb[0].mxu0 %vm274_vm0, %v319_v32 }
 0x267   : > { %v554_v34 = vpop.f32.mrb[0].mxu0 }
 0x268   : > { %v407_v35 = vadd.f32 %v554_v34, %v534_v33  ;;  %v401_v36 = vpop.f32.mrb[1].mxu0 }
 0x269   : > { %v402_v37 = vadd.f32 %v534_v33, %v401_v36 }
 0x26a   : > { %412 = vst.msk [vmem:[%s268_s29 + $0x8] sm:$0xff] %vm410_vm1, %v407_v35 }
 0x26b   : > { %411 = vst.msk [vmem:[%s268_s29] sm:$0xff] %vm410_vm1, %v402_v37 }
 0x26c   : > { %695 = shalt.err (!%p692_p9)
}
 0x26d   : > { %s696_s14 = scalar_lea.hbm %s975_s16, 256  ;;  %s700_s12 = scalar_lea.hbm %s1024_s5, 512 }
 0x26e   : > { %p697_p1 = scmp.ne.s32.totalorder %s975_s16, %s696_s14  ;;  %p701_p2 = scmp.lt.u32.totalorder %s975_s16, %s1024_s5 }
 0x26f   : > { %p702_p11 = scmp.lt.u32.totalorder %s700_s12, %s696_s14  ;;  %p704_p6 = scmp.lt.u32.totalorder %s696_s14, %s975_s16 }
 0x270   : > { %p698_p0 = pnand %p697_p1, %p885_p12 }
 0x271   : > { %p703_p4 = por %p702_p11, %p701_p2 }
 0x272   : > { %p699_p5 = pneg %p698_p0 }
 0x273   : > { %p705_p8 = por %p704_p6, %p703_p4 }
 0x275   : > { %p706_p10 = pnand %p705_p8, %p699_p5 }
 0x277   : > { %709 = shalt.err (!%p706_p10)
}
 0x278   : > { %s759_s27 = smov 128   ;;  %s760_s10 = smov 8  }
 0x279   : > { %565 = dma.vmem_to_hbm [thread:$0]  (%p885_p12), %s970_s28, 256, %s975_s16, %s414_s7, %s759_s27, %s759_s27, %s760_s10  }
 0x27a PF: > { %s442_s11 = sand.u32 1, %s740_s18   ;;  %p1039_p13 = scmp.ne.s32.totalorder %s1029_s25, 0 }
 0x27b   : > { %p1040_p3 = scmp.ge.s32.totalorder %s752_s21, 2  ;;  %s443_s24 = scalar_lea.sflag [#allocation4], %s442_s11 }
 0x27d   : > { %p576_p7 = pnand %p1040_p3, %p1039_p13 }
 0x27f   : > { %735 = dma.done.wait (!%p576_p7), %s443_s24, 256  }
 0x280   : > { %737 = vsyncadd (!%p576_p7), %s443_s24, 4294967040  ;;  %p19_p9 = scmp.ge.s32.totalorder %s847_s30, 4   ;;  %s1041_s18 = smov %s744_s19 }
 0x281   : > { %s1042_s19 = smov %s748_s20  ;;  %s1043_s20 = smov %s881_s8 }
 0x282   : > { %s1044_s21 = smov %s847_s30  ;;  %21 = sbr.rel (!%p19_p9) target bundleno = 6 (0x6), region = 93 }
 0x289   :  { %448 = vsyncpa [#allocation3], 1 }
 0x28a   :  { %450 = vsyncpa [#allocation3 + $0x1], 1 }
 0x28b   :  { %451 = vsyncpa [#allocation6], 1 }
 0x28c   :  { %453 = vsyncpa [#allocation6 + $0x1], 1 }
 0x28d   :  { %454 = vsyncpa [#allocation4], 1 }
 0x28e   :  { %456 = vsyncpa [#allocation4 + $0x1], 1 }

</bundles_post_ra>
